<compile_context>
chip_gen: v7x
topology: tpu7x:2x2x1
jax: 0.10.0
libtpu: 0.0.40
codegen_flags: <defaults>
</compile_context>

<pallas_src>
import functools

import jax
import jax.numpy as jnp
from jax import lax
from jax.experimental import pallas as pl
from jax.experimental.pallas import tpu as pltpu


def linear_kernel_inplace(x_ref, w_ref, b_ref, o_ref):
    """f32 output: accumulate directly into o_ref. No scratch, no epilogue pass.

    x_ref: (tm, tk)   activation tile
    w_ref: (tn, tk)   weight tile, native (OUT, IN) layout
    b_ref: (1,  tn)   bias tile
    o_ref: (tm, tn)   output tile (resident across the K grid axis)
    """
    k = pl.program_id(2)

    @pl.when(k == 0)
    def _():
        # Fold bias into the init: deletes a full (tm, tn) VPU add in finalize.
        o_ref[...] = jnp.broadcast_to(b_ref[...], o_ref.shape).astype(o_ref.dtype)

    # x @ W^T without transposing W: contract the IN dim of both operands
    # (the MXU takes the transposed operand natively).
    o_ref[...] += lax.dot_general(
        x_ref[...], w_ref[...],
        dimension_numbers=(((1,), (1,)), ((), ())),
        preferred_element_type=jnp.float32,
    )


def linear_kernel_scratch(x_ref, w_ref, b_ref, o_ref, acc_ref):
    """Sub-f32 output: f32 VMEM accumulator, single cast in the finalize step."""
    k = pl.program_id(2)

    @pl.when(k == 0)
    def _():
        acc_ref[...] = jnp.broadcast_to(b_ref[...], acc_ref.shape).astype(jnp.float32)

    acc_ref[...] += lax.dot_general(
        x_ref[...], w_ref[...],
        dimension_numbers=(((1,), (1,)), ((), ())),
        preferred_element_type=jnp.float32,
    )

    @pl.when(k == pl.num_programs(2) - 1)
    def _():
        o_ref[...] = acc_ref[...].astype(o_ref.dtype)


def _round_up(v, m):
    return ((v + m - 1) // m) * m


def _select_kernel(out_dtype, tm, tn):
    if jnp.dtype(out_dtype) == jnp.dtype(jnp.float32):
        return linear_kernel_inplace, []
    return linear_kernel_scratch, [pltpu.VMEM((tm, tn), jnp.float32)]


@functools.partial(jax.jit, static_argnames=("tm", "tn", "tk"))
def linear_pallas(x, w, b, *, tm=None, tn=None, tk=None):
    """x: (B, IN), w: (OUT, IN), b: (OUT,)  ->  (B, OUT);  y = x @ w.T + b."""
    B, IN = x.shape
    OUT, IN_w = w.shape
    assert IN == IN_w and b.shape == (OUT,)

    out_dtype = x.dtype
    itemsize = jnp.dtype(x.dtype).itemsize
    b2 = b.reshape(1, OUT)

    # ---------------- tiny-shape fast path (the shipped SimpleModel size) -----
    # Full-array blocks are always legal (block_shape == array dims), so when the
    # double-buffered footprint is small we skip padding/slicing entirely and run
    # a single (1,1,1) grid step. Launch-overhead bound; nothing to tile.
    footprint = 2 * itemsize * (B * IN + OUT * IN + OUT) + 2 * 4 * B * OUT
    if footprint <= 8 * 1024 * 1024:
        kernel, scratch = _select_kernel(out_dtype, B, OUT)
        return pl.pallas_call(
            kernel,
            out_shape=jax.ShapeDtypeStruct((B, OUT), out_dtype),
            grid_spec=pltpu.PrefetchScalarGridSpec(
                num_scalar_prefetch=0,
                grid=(1, 1, 1),
                in_specs=[
                    pl.BlockSpec((B, IN), lambda i, j, k: (0, 0)),    # x, unpadded
                    pl.BlockSpec((OUT, IN), lambda i, j, k: (0, 0)),  # W, native (OUT, IN)
                    pl.BlockSpec((1, OUT), lambda i, j, k: (0, 0)),   # bias
                ],
                out_specs=pl.BlockSpec((B, OUT), lambda i, j, k: (0, 0)),
                scratch_shapes=scratch,
            ),
            compiler_params=pltpu.CompilerParams(
                dimension_semantics=("parallel", "parallel", "arbitrary"),
            ),
        )(x, w, b2)

    # ---------------- general tiled path (scaled-up shapes) -------------------
    # Bigger defaults than before: amortizes ~0.35 us/step grid overhead and
    # halves weight re-fetch traffic (W tile is re-DMA'd once per i).
    tm = tm or min(512, _round_up(B, 8))
    tn = tn or min(256, _round_up(OUT, 128))
    tk = tk or min(1024, _round_up(IN, 128))

    Bp, OUTp, INp = _round_up(B, tm), _round_up(OUT, tn), _round_up(IN, tk)

    # Zero-pad to tile boundaries (no-op when already aligned). Zero IN-padding
    # contributes nothing to the dot; OUT-padding keeps stores lane-dense.
    x_p = x if (Bp == B and INp == IN) else jnp.pad(x, ((0, Bp - B), (0, INp - IN)))
    w_p = w if (OUTp == OUT and INp == IN) else jnp.pad(w, ((0, OUTp - OUT), (0, INp - IN)))
    b_p = b2 if OUTp == OUT else jnp.pad(b2, ((0, 0), (0, OUTp - OUT)))

    grid = (Bp // tm, OUTp // tn, INp // tk)
    kernel, scratch = _select_kernel(out_dtype, tm, tn)

    # Scoped-VMEM budget from the actual double-buffered tile footprint, capped
    # at 48 MiB so it stays under v7x's 64 MiB physical VMEM with headroom
    # (v5e/v6e have 128 MiB, so the cap is never binding there at these tiles).
    est_live = (2 * itemsize * (tm * tk + tn * tk + tn)
                + 2 * itemsize * tm * tn
                + (tm * tn * 4 if scratch else 0))
    vmem_limit = int(min(max(32 * 1024 * 1024, 2 * est_live), 48 * 1024 * 1024))

    out_p = pl.pallas_call(
        kernel,
        out_shape=jax.ShapeDtypeStruct((Bp, OUTp), out_dtype),
        grid_spec=pltpu.PrefetchScalarGridSpec(
            num_scalar_prefetch=0,
            grid=grid,
            in_specs=[
                pl.BlockSpec((tm, tk), lambda i, j, k: (i, k)),  # x tile
                pl.BlockSpec((tn, tk), lambda i, j, k: (j, k)),  # W tile, native (OUT, IN)
                pl.BlockSpec((1, tn), lambda i, j, k: (0, j)),   # bias tile
            ],
            out_specs=pl.BlockSpec((tm, tn), lambda i, j, k: (i, j)),
            scratch_shapes=scratch,
        ),
        compiler_params=pltpu.CompilerParams(
            # M/N output tiles independent -> megacore-shardable; K is the reduction.
            dimension_semantics=("parallel", "parallel", "arbitrary"),
            vmem_limit_bytes=vmem_limit,
        ),
    )(x_p, w_p, b_p)

    return out_p if (Bp == B and OUTp == OUT) else out_p[:B, :OUT]


if __name__ == "__main__":
    key = jax.random.PRNGKey(0)
    kx, kw, kb = jax.random.split(key, 3)

    B, IN, OUT = 8, 10, 2  # SimpleModel: nn.Linear(10, 2)

    x = jax.random.normal(kx, (B, IN), dtype=jnp.float32)
    # Deterministic params mimicking nn.Linear default init (uniform +-1/sqrt(IN)).
    bound = (1.0 / IN) ** 0.5
    w = jax.random.uniform(kw, (OUT, IN), dtype=jnp.float32, minval=-bound, maxval=bound)
    b = jax.random.uniform(kb, (OUT,), dtype=jnp.float32, minval=-bound, maxval=bound)

    y = linear_pallas(x, w, b)
    jax.block_until_ready(y)

    # Correctness check against the plain-JAX reference of the PyTorch forward.
    y_ref = x @ w.T + b
    assert y.shape == (B, OUT)
    assert jnp.allclose(y, y_ref, atol=1e-5, rtol=1e-5)

    print("KERNEL_OK")
</pallas_src>

<mosaic_0001>
module attributes {stable_mosaic.version = 11 : i64} {
  func.func @linear_kernel_inplace(%arg0: i32, %arg1: i32, %arg2: i32, %arg3: memref<8x10xf32, #tpu.memory_space<vmem>>, %arg4: memref<2x10xf32, #tpu.memory_space<vmem>>, %arg5: memref<1x2xf32, #tpu.memory_space<vmem>>, %arg6: memref<8x2xf32, #tpu.memory_space<vmem>>) attributes {dimension_semantics = [#tpu.dimension_semantics<parallel>, #tpu.dimension_semantics<parallel>, #tpu.dimension_semantics<arbitrary>], iteration_bounds = array<i64: 1, 1, 1>, scalar_prefetch = 0 : i64, scratch_operands = 0 : i64, tpu.core_type = #tpu.core_type<tc>, window_params = [{pipeline_mode = #tpu.pipeline_mode<synchronous>, transform_indices = @transform_0, window_bounds = array<i64: 8, 10>}, {pipeline_mode = #tpu.pipeline_mode<synchronous>, transform_indices = @transform_1, window_bounds = array<i64: 2, 10>}, {pipeline_mode = #tpu.pipeline_mode<synchronous>, transform_indices = @transform_2, window_bounds = array<i64: 1, 2>}, {pipeline_mode = #tpu.pipeline_mode<synchronous>, transform_indices = @transform_3, window_bounds = array<i64: 8, 2>}]} {
    %c0_i32 = arith.constant 0 : i32
    %0 = arith.cmpi eq, %arg2, %c0_i32 : i32
    %1 = arith.extui %0 : i1 to i32
    %c0_i32_0 = arith.constant 0 : i32
    %2 = arith.cmpi ne, %1, %c0_i32_0 : i32
    scf.if %2 {
      %c0_8 = arith.constant 0 : index
      %c0_9 = arith.constant 0 : index
      %9 = vector.load %arg5[%c0_8, %c0_9] : memref<1x2xf32, #tpu.memory_space<vmem>>, vector<1x2xf32>
      %10 = vector.shape_cast %9 : vector<1x2xf32> to vector<1x2xf32>
      %11 = vector.broadcast %10 : vector<1x2xf32> to vector<8x2xf32>
      %c0_10 = arith.constant 0 : index
      %c0_11 = arith.constant 0 : index
      %12 = vector.load %arg6[%c0_10, %c0_11] : memref<8x2xf32, #tpu.memory_space<vmem>>, vector<8x2xf32>
      tpu.vector_store %arg6[%c0_10, %c0_11], %11 {strides = array<i32>} : memref<8x2xf32, #tpu.memory_space<vmem>>, vector<8x2xf32>,
    } else {
    }
    %c0 = arith.constant 0 : index
    %c0_1 = arith.constant 0 : index
    %3 = vector.load %arg6[%c0, %c0_1] : memref<8x2xf32, #tpu.memory_space<vmem>>, vector<8x2xf32>
    %c0_2 = arith.constant 0 : index
    %c0_3 = arith.constant 0 : index
    %4 = vector.load %arg3[%c0_2, %c0_3] : memref<8x10xf32, #tpu.memory_space<vmem>>, vector<8x10xf32>
    %c0_4 = arith.constant 0 : index
    %c0_5 = arith.constant 0 : index
    %5 = vector.load %arg4[%c0_4, %c0_5] : memref<2x10xf32, #tpu.memory_space<vmem>>, vector<2x10xf32>
    %cst = arith.constant dense<0.000000e+00> : vector<8x2xf32>
    %6 = tpu.matmul %4, %5, %cst {dimension_numbers = #tpu.dot_dimension_numbers<[1], [1], [0], [0], [0, 0, 1, 0], [], []>} : vector<8x10xf32>, vector<2x10xf32>, vector<8x2xf32> -> vector<8x2xf32>
    %7 = arith.addf %3, %6 : vector<8x2xf32>
    %c0_6 = arith.constant 0 : index
    %c0_7 = arith.constant 0 : index
    %8 = vector.load %arg6[%c0_6, %c0_7] : memref<8x2xf32, #tpu.memory_space<vmem>>, vector<8x2xf32>
    tpu.vector_store %arg6[%c0_6, %c0_7], %7 {strides = array<i32>} : memref<8x2xf32, #tpu.memory_space<vmem>>, vector<8x2xf32>,
    return
  }
  func.func @transform_0(%arg0: i32, %arg1: i32, %arg2: i32) -> (i32, i32) {
    %c0_i32 = arith.constant 0 : i32
    %c0_i32_0 = arith.constant 0 : i32
    %c0_i32_1 = arith.constant 0 : i32
    return %c0_i32, %c0_i32_0 : i32, i32
  }
  func.func @transform_1(%arg0: i32, %arg1: i32, %arg2: i32) -> (i32, i32) {
    %c0_i32 = arith.constant 0 : i32
    %c0_i32_0 = arith.constant 0 : i32
    %c0_i32_1 = arith.constant 0 : i32
    return %c0_i32, %c0_i32_0 : i32, i32
  }
  func.func @transform_2(%arg0: i32, %arg1: i32, %arg2: i32) -> (i32, i32) {
    %c0_i32 = arith.constant 0 : i32
    %c0_i32_0 = arith.constant 0 : i32
    %c0_i32_1 = arith.constant 0 : i32
    return %c0_i32, %c0_i32_0 : i32, i32
  }
  func.func @transform_3(%arg0: i32, %arg1: i32, %arg2: i32) -> (i32, i32) {
    %c0_i32 = arith.constant 0 : i32
    %c0_i32_0 = arith.constant 0 : i32
    %c0_i32_1 = arith.constant 0 : i32
    return %c0_i32, %c0_i32_0 : i32, i32
  }
}

</mosaic_0001>

<bundles_post_ra>
// kernel: linear_pallas.1
= control target key start
LH: loop header
LB: loop body
LE: loop exit
PB: predicated region body
PF: predicated region fallthrough
CT: control target
= control target key end

     0   :  { %8 = vsyncpa [#allocation3], 0  ;;  %s164_s12 = smov [#allocation2]   ;;  %s214_s0 = inlined_call_operand.hbm [shape: f32[8,10], index: 0, kind: input, shape index: {}]   ;;  %s215_s1 = inlined_call_operand.vmem [shape: f32[2,10], index: 1, kind: input, shape index: {}]   ;;  %s216_s2 = inlined_call_operand.vmem [shape: f32[1,2], index: 2, kind: input, shape index: {}]   ;;  %s217_s3 = inlined_call_operand.vmem [shape: f32[8,2], index: 3, kind: output, shape index: {}]  }
   0x1   :  { %s15_s13 = sshll.u32 %s164_s12, 4  ;;  %s140_s16 = scalar_lea.hbm %s214_s0, 128  ;;  %s16_s13 = int_to_ptr.vmem [resolvable:$true] %s15_s13 }
   0x2   :  { %p141_p0 = scmp.ne.s32.totalorder %s214_s0, %s140_s16  ;;  %p144_p1 = scmp.lt.u32.totalorder %s140_s16, %s214_s0 }
   0x4   :  { %p146_p2 = pnand %p144_p1, %p141_p0 }
   0x6   :  { %149 = shalt.err (!%p146_p2)
}
   0x7   :  { %s150_s21 = scalar_lea.vmem %s16_s13, 128  ;;  %p155_p4 = scmp.lt.s32.totalorder %s16_s13, %s16_s13 }
   0x8   :  { %p151_p3 = scmp.ne.s32.totalorder %s16_s13, %s150_s21  ;;  %p156_p5 = scmp.lt.s32.totalorder %s150_s21, %s150_s21 }
   0xa   :  { %p157_p6 = por %p156_p5, %p155_p4 }
   0xc   :  { %p158_p7 = pnand %p157_p6, %p151_p3 }
   0xe   :  { %161 = shalt.err (!%p158_p7)
}
   0xf   :  { %18 = dma.hbm_to_vmem [thread:$0]  %s214_s0, 128, %s16_s13, [#allocation3]  }
  0x10   :  { %162 = dma.done.wait [#allocation3], 128  }
  0x11   :  { %163 = vsyncadd [#allocation3], 4294967168  ;;  %v165_v0 = vmov 0.0   ;;  %vm166_vm0 = vmmov 0   ;;  %vm37_vm1 = vcmask 15360   ;;  %vm42_vm2 = vcmask 80896  }
  0x12   :  { %132 = vmatprep.subr.mxu0 %v165_v0  ;;  %134 = vmatprep.mubr.msk.f32.mxu0 %vm166_vm0, %v165_v0  ;;  %v127_v1 = vld [vmem:[%s216_s2] ss:$0 sm:$0xff] }
  0x13   :  { %v41_v2 = vld [vmem:[%s215_s1] sm:$0x3]  ;;  %38 = vst.msk [vmem:[%s217_s3] sm:$0xff] %vm37_vm1, %v127_v1 }
  0x14   :  { %133 = vmatpush3.xpose.msk.msra.mxu0 %vm42_vm2, %v41_v2  ;;  %v40_v3 = vld [vmem:[#allocation2] sm:$0xff] }
  0x17   :  { %135 = vmatmul.mubr.msk.f32.vlgmr.msra.gmra.mrb[0].mxu0 %vm42_vm2, %v40_v3 }
  0x1a   :  { %v39_v4 = vld [vmem:[%s217_s3] sm:$0xff] }
  0xea   :  { %v115_v5 = vpop.f32.mrb[0].mxu0 }
  0xeb   :  { %v119_v6 = vadd.f32 %v115_v5, %v39_v4  ;;  %v136_v7 = vpop.f32.mrb[1].mxu0 }
  0xed   :  { %121 = vst.msk [vmem:[%s217_s3] sm:$0xff] %vm37_vm1, %v119_v6 }
  0xee   :  { %126 = vsyncpa [#allocation3], 1 }

</bundles_post_ra>
